<compile_context>
chip_gen: v6e
topology: v6e:2x2x1
jax: 0.10.0
libtpu: 0.0.40
codegen_flags: <defaults>
</compile_context>

<pallas_src>
import functools
import math

import numpy as np

import jax
import jax.numpy as jnp
from jax.experimental import pallas as pl
from jax.experimental.pallas import tpu as pltpu


def _cdiv(a, b):
    return -(-a // b)


# --------------------------------------------------------------------------
# Deterministic parameter / constant setup (plain numpy "glue").
# --------------------------------------------------------------------------
def hann_window_np(window_size: int) -> np.ndarray:
    # torch.hann_window(W) (periodic=True): w[n] = 0.5 * (1 - cos(2*pi*n/W))
    n = np.arange(window_size, dtype=np.float64)
    return (0.5 * (1.0 - np.cos(2.0 * np.pi * n / window_size))).astype(np.float32)


def dfrft_matrix_np(N: int, a: float) -> np.ndarray:
    """Candan-Kutay-Ozaktas discrete fractional Fourier transform matrix.
    Returns complex64 (N, N); transform along a dim is y = F @ x.  Built
    host-side (eigendecomposition has no Pallas equivalent) -- deterministic
    parameter setup."""
    n = np.arange(N, dtype=np.float64)
    S = np.diag(2.0 * np.cos(2.0 * np.pi * n / N) - 4.0)
    S += np.diag(np.ones(N - 1), 1) + np.diag(np.ones(N - 1), -1)
    S[0, N - 1] += 1.0
    S[N - 1, 0] += 1.0

    P = np.zeros((N, N), dtype=np.float64)
    P[0, 0] = 1.0
    half = N // 2
    for k in range(1, (N + 1) // 2):
        P[k, k] = 1.0 / math.sqrt(2.0)
        P[k, N - k] = 1.0 / math.sqrt(2.0)
        P[N - k, k] = 1.0 / math.sqrt(2.0)
        P[N - k, N - k] = -1.0 / math.sqrt(2.0)
    if N % 2 == 0:
        P[half, half] = 1.0

    CS = P @ S @ P.T
    ne = half + 1
    Ev = CS[:ne, :ne]
    Od = CS[ne:, ne:]
    _, Ve = np.linalg.eigh(Ev)
    _, Vo = np.linalg.eigh(Od)
    Ve = Ve[:, ::-1]
    Vo = Vo[:, ::-1]

    E_even = P @ np.vstack([Ve, np.zeros((N - ne, ne))])
    E_odd = P @ np.vstack([np.zeros((ne, N - ne)), Vo])

    if N % 2 == 0:
        k_even = np.arange(0, N + 1, 2)
        k_odd = np.arange(1, N - 2, 2)
    else:
        k_even = np.arange(0, N, 2)
        k_odd = np.arange(1, N, 2)

    U = np.concatenate([E_even, E_odd], axis=1)
    k = np.concatenate([k_even, k_odd]).astype(np.float64)
    evals = np.exp(-1j * (np.pi / 2.0) * a * k)
    F = (U * evals[None, :]) @ U.T
    return F.astype(np.complex64)


# --------------------------------------------------------------------------
# Pallas kernel: gather T windows as values, one 3-pass bf16 MXU matmul group.
# --------------------------------------------------------------------------
def _stfrft_kernel(T, BCp, step, W, x_ref, rh_ref, rl_ref, out_ref):
    base = pl.program_id(0) * T
    # Gather T window slices and stack them into a (T*BCp, W) LHS tile.  No
    # Hann multiply here: the window is folded into rh/rl host-side.
    slabs = []
    for i in range(T):
        start = (base + i) * step
        if step % 128 == 0:
            start = pl.multiple_of(start, 128)      # lane-aligned fast path
        slabs.append(x_ref[:, pl.ds(start, W)])
    xw = jnp.concatenate(slabs, axis=0)             # (T*BCp, W) f32

    # bf16 hi/lo split of the LHS (RHS is pre-split host-side).  3-pass bf16
    # matmul: native MXU rate on all generations, near-f32 accuracy.
    xh = xw.astype(jnp.bfloat16)
    xl = (xw - xh.astype(jnp.float32)).astype(jnp.bfloat16)
    y = jnp.dot(xh, rh_ref[...], preferred_element_type=jnp.float32)
    y = y + jnp.dot(xl, rh_ref[...], preferred_element_type=jnp.float32)
    y = y + jnp.dot(xh, rl_ref[...], preferred_element_type=jnp.float32)

    out_ref[...] = y.reshape(out_ref.shape)         # (T, BCp, WO): free relabel


def feature_extractor_stfrft(x, window_size, frft_order, overlap,
                             only_use_real=False):
    """x: (B, C, L) float32  ->  (B, 2*C, num_windows, window_size) float32
    (or (B, C, num_windows, window_size) if only_use_real)."""
    B, C, L = x.shape
    W = window_size
    step = W - overlap
    assert step > 0, "window_size must exceed overlap"
    NW = (L - W) // step + 1
    assert NW >= 1, "signal shorter than one window"
    BC = B * C
    BCp = _cdiv(BC, 8) * 8                      # pad rows to sublane multiple
    WO = W if only_use_real else 2 * W

    # Generation-aware VMEM budget (v7x has 64 MiB/TC, v5e/v6e 128 MiB).
    try:
        vmem_cap = int(pltpu.get_tpu_info().vmem_capacity_bytes)
    except Exception:
        vmem_cap = 64 * 2 ** 20

    def est_vmem(T_):
        nt = _cdiv(NW, T_)
        Lp = (nt * T_ - 1) * step + W
        M = T_ * BCp
        return (2 * BCp * Lp * 4        # resident signal (double-buffered)
                + 2 * 2 * W * WO * 2    # rh, rl bf16 (double-buffered)
                + 2 * M * WO * 4        # output block (double-buffered)
                + M * W * 4             # gathered f32 LHS value
                + 2 * M * W * 2         # bf16 hi/lo LHS values
                + M * WO * 4)           # f32 accumulator value

    # Batch T windows per grid step so the MXU LHS has ~512 rows.
    T = max(1, min(NW, 512 // BCp))
    if NW > 1 and _cdiv(NW, T) < 2:
        T = _cdiv(NW, 2)                # >=2 grid steps: feed both v7x TCs
    while T > 1 and est_vmem(T) > int(0.8 * vmem_cap):
        T = _cdiv(T, 2)                 # shrink if the footprint is too large
    num_tiles = _cdiv(NW, T)
    NW_pad = num_tiles * T
    L_pad = (NW_pad - 1) * step + W     # padded windows read zeros

    # Host-side constants: fold Hann into the (transposed) DFrFT matrix, fuse
    # real|imag into one lane-dense RHS, and split it into bf16 hi/lo parts.
    hann = hann_window_np(W)
    F = dfrft_matrix_np(W, frft_order)
    if only_use_real:
        rhs = np.ascontiguousarray(F.real.T)                       # (W, W)
    else:
        rhs = np.concatenate([F.real.T, F.imag.T], axis=1)         # (W, 2W)
    rhs32 = jnp.asarray((hann[:, None] * rhs).astype(np.float32))
    rh = rhs32.astype(jnp.bfloat16)
    rl = (rhs32 - rh.astype(jnp.float32)).astype(jnp.bfloat16)

    x2 = x.reshape(BC, L).astype(jnp.float32)
    if BCp != BC or L_pad != L:
        x2 = jnp.pad(x2, ((0, BCp - BC), (0, L_pad - L)))

    kernel = functools.partial(_stfrft_kernel, T, BCp, step, W)
    vmem_limit = int(min(0.9 * vmem_cap, max(32 * 2 ** 20, 2 * est_vmem(T))))

    # TODO(synk): for very long signals on v7x (64 MiB VMEM/TC), stream
    # per-step slabs of x from HBM (pl.BoundedSlice / manual DMA) instead of
    # keeping the whole padded signal resident and double-buffered.
    y = pl.pallas_call(
        kernel,
        out_shape=jax.ShapeDtypeStruct((NW_pad, BCp, WO), jnp.float32),
        grid_spec=pltpu.PrefetchScalarGridSpec(
            num_scalar_prefetch=0,
            grid=(num_tiles,),
            in_specs=[
                pl.BlockSpec((BCp, L_pad), lambda t: (0, 0)),   # full signal
                pl.BlockSpec((W, WO), lambda t: (0, 0)),        # hann*[Re|Im](F).T hi
                pl.BlockSpec((W, WO), lambda t: (0, 0)),        # hann*[Re|Im](F).T lo
            ],
            out_specs=pl.BlockSpec((T, BCp, WO), lambda t: (t, 0, 0)),
        ),
        compiler_params=pltpu.CompilerParams(
            dimension_semantics=("parallel",),      # no accumulator -> megacore
            vmem_limit_bytes=vmem_limit),
    )(x2, rh, rl)

    # Drop padding, then one fused transpose/reshape to the PyTorch layout.
    y = y[:NW, :BC]                                   # (NW, BC, WO)
    if only_use_real:
        return y.reshape(NW, B, C, W).transpose(1, 2, 0, 3)          # (B,C,NW,W)
    y = y.reshape(NW, B, C, 2, W)
    return jnp.transpose(y, (1, 3, 2, 0, 4)).reshape(B, 2 * C, NW, W)


# --------------------------------------------------------------------------
# Demo / correctness check.
# --------------------------------------------------------------------------
if __name__ == "__main__":
    B, C, L = 2, 4, 1024
    window_size, overlap, frft_order = 256, 128, 0.5
    only_use_real = False

    key = jax.random.PRNGKey(0)
    x = jax.random.normal(key, (B, C, L), dtype=jnp.float32)

    out = feature_extractor_stfrft(x, window_size, frft_order, overlap,
                                   only_use_real=only_use_real)
    out = jax.block_until_ready(out)

    # Pure-JAX reference (same math, no Pallas, full-precision real matmuls).
    step = window_size - overlap
    nw = (L - window_size) // step + 1
    hann = jnp.asarray(hann_window_np(window_size))
    idx = jnp.arange(nw)[:, None] * step + jnp.arange(window_size)[None, :]
    XW = x[:, :, idx] * hann                                   # (B, C, NW, W)
    F = dfrft_matrix_np(window_size, frft_order)               # (W, W) complex64
    Fr = jnp.asarray(np.ascontiguousarray(F.real).astype(np.float32))
    Fi = jnp.asarray(np.ascontiguousarray(F.imag).astype(np.float32))
    Yr = jnp.einsum("bcwn,mn->bcwm", XW, Fr,
                    precision=jax.lax.Precision.HIGHEST)
    Yi = jnp.einsum("bcwn,mn->bcwm", XW, Fi,
                    precision=jax.lax.Precision.HIGHEST)
    ref = jnp.concatenate([Yr, Yi], axis=1)

    assert out.shape == (B, 2 * C, nw, window_size), out.shape
    np.testing.assert_allclose(np.asarray(out), np.asarray(ref),
                               rtol=1e-3, atol=1e-3)
    print("KERNEL_OK")
</pallas_src>

<mosaic_0001>
module attributes {stable_mosaic.version = 11 : i64} {
  func.func @_stfrft_kernel(%arg0: i32, %arg1: memref<8x1152xf32, #tpu.memory_space<vmem>>, %arg2: memref<256x512xbf16, #tpu.memory_space<vmem>>, %arg3: memref<256x512xbf16, #tpu.memory_space<vmem>>, %arg4: memref<4x8x512xf32, #tpu.memory_space<vmem>>) attributes {dimension_semantics = [#tpu.dimension_semantics<parallel>], iteration_bounds = array<i64: 2>, scalar_prefetch = 0 : i64, scratch_operands = 0 : i64, tpu.core_type = #tpu.core_type<tc>, window_params = [{pipeline_mode = #tpu.pipeline_mode<synchronous>, transform_indices = @transform_0, window_bounds = array<i64: 8, 1152>}, {pipeline_mode = #tpu.pipeline_mode<synchronous>, transform_indices = @transform_1, window_bounds = array<i64: 256, 512>}, {pipeline_mode = #tpu.pipeline_mode<synchronous>, transform_indices = @transform_2, window_bounds = array<i64: 256, 512>}, {transform_indices = @transform_3, window_bounds = array<i64: 4, 8, 512>}]} {
    %c4_i32 = arith.constant 4 : i32
    %0 = arith.muli %arg0, %c4_i32 : i32
    %c0_i32 = arith.constant 0 : i32
    %1 = arith.addi %0, %c0_i32 : i32
    %c128_i32 = arith.constant 128 : i32
    %2 = arith.muli %1, %c128_i32 : i32
    %3 = tpu.assume_multiple %2, 128 : i32
    %c0 = arith.constant 0 : index
    %4 = arith.index_cast %3 : i32 to index
    %5 = vector.load %arg1[%c0, %4] : memref<8x1152xf32, #tpu.memory_space<vmem>>, vector<8x256xf32>
    %c1_i32 = arith.constant 1 : i32
    %6 = arith.addi %0, %c1_i32 : i32
    %c128_i32_0 = arith.constant 128 : i32
    %7 = arith.muli %6, %c128_i32_0 : i32
    %8 = tpu.assume_multiple %7, 128 : i32
    %c0_1 = arith.constant 0 : index
    %9 = arith.index_cast %8 : i32 to index
    %10 = vector.load %arg1[%c0_1, %9] : memref<8x1152xf32, #tpu.memory_space<vmem>>, vector<8x256xf32>
    %c2_i32 = arith.constant 2 : i32
    %11 = arith.addi %0, %c2_i32 : i32
    %c128_i32_2 = arith.constant 128 : i32
    %12 = arith.muli %11, %c128_i32_2 : i32
    %13 = tpu.assume_multiple %12, 128 : i32
    %c0_3 = arith.constant 0 : index
    %14 = arith.index_cast %13 : i32 to index
    %15 = vector.load %arg1[%c0_3, %14] : memref<8x1152xf32, #tpu.memory_space<vmem>>, vector<8x256xf32>
    %c3_i32 = arith.constant 3 : i32
    %16 = arith.addi %0, %c3_i32 : i32
    %c128_i32_4 = arith.constant 128 : i32
    %17 = arith.muli %16, %c128_i32_4 : i32
    %18 = tpu.assume_multiple %17, 128 : i32
    %c0_5 = arith.constant 0 : index
    %19 = arith.index_cast %18 : i32 to index
    %20 = vector.load %arg1[%c0_5, %19] : memref<8x1152xf32, #tpu.memory_space<vmem>>, vector<8x256xf32>
    %21 = tpu.concatenate %5, %10, %15, %20 in 0 : vector<8x256xf32>, vector<8x256xf32>, vector<8x256xf32>, vector<8x256xf32> -> vector<32x256xf32>
    %22 = arith.truncf %21 : vector<32x256xf32> to vector<32x256xbf16>
    %23 = arith.extf %22 : vector<32x256xbf16> to vector<32x256xf32>
    %24 = arith.subf %21, %23 : vector<32x256xf32>
    %25 = arith.truncf %24 : vector<32x256xf32> to vector<32x256xbf16>
    %c0_6 = arith.constant 0 : index
    %c0_7 = arith.constant 0 : index
    %26 = vector.load %arg2[%c0_6, %c0_7] : memref<256x512xbf16, #tpu.memory_space<vmem>>, vector<256x512xbf16>
    %cst = arith.constant dense<0.000000e+00> : vector<32x512xf32>
    %27 = tpu.matmul %22, %26, %cst {dimension_numbers = #tpu.dot_dimension_numbers<[1], [0], [0], [1], [0, 0, 1, 1], [], []>} : vector<32x256xbf16>, vector<256x512xbf16>, vector<32x512xf32> -> vector<32x512xf32>
    %c0_8 = arith.constant 0 : index
    %c0_9 = arith.constant 0 : index
    %28 = vector.load %arg2[%c0_8, %c0_9] : memref<256x512xbf16, #tpu.memory_space<vmem>>, vector<256x512xbf16>
    %cst_10 = arith.constant dense<0.000000e+00> : vector<32x512xf32>
    %29 = tpu.matmul %25, %28, %cst_10 {dimension_numbers = #tpu.dot_dimension_numbers<[1], [0], [0], [1], [0, 0, 1, 1], [], []>} : vector<32x256xbf16>, vector<256x512xbf16>, vector<32x512xf32> -> vector<32x512xf32>
    %30 = arith.addf %27, %29 : vector<32x512xf32>
    %c0_11 = arith.constant 0 : index
    %c0_12 = arith.constant 0 : index
    %31 = vector.load %arg3[%c0_11, %c0_12] : memref<256x512xbf16, #tpu.memory_space<vmem>>, vector<256x512xbf16>
    %cst_13 = arith.constant dense<0.000000e+00> : vector<32x512xf32>
    %32 = tpu.matmul %22, %31, %cst_13 {dimension_numbers = #tpu.dot_dimension_numbers<[1], [0], [0], [1], [0, 0, 1, 1], [], []>} : vector<32x256xbf16>, vector<256x512xbf16>, vector<32x512xf32> -> vector<32x512xf32>
    %33 = arith.addf %30, %32 : vector<32x512xf32>
    %34 = vector.shape_cast %33 : vector<32x512xf32> to vector<4x8x512xf32>
    %c0_14 = arith.constant 0 : index
    %c0_15 = arith.constant 0 : index
    %c0_16 = arith.constant 0 : index
    %35 = vector.load %arg4[%c0_14, %c0_15, %c0_16] : memref<4x8x512xf32, #tpu.memory_space<vmem>>, vector<4x8x512xf32>
    tpu.vector_store %arg4[%c0_14, %c0_15, %c0_16], %34 {strides = array<i32>} : memref<4x8x512xf32, #tpu.memory_space<vmem>>, vector<4x8x512xf32>,
    return
  }
  func.func @transform_0(%arg0: i32) -> (i32, i32) {
    %c0_i32 = arith.constant 0 : i32
    %c0_i32_0 = arith.constant 0 : i32
    %c0_i32_1 = arith.constant 0 : i32
    return %c0_i32, %c0_i32_0 : i32, i32
  }
  func.func @transform_1(%arg0: i32) -> (i32, i32) {
    %c0_i32 = arith.constant 0 : i32
    %c0_i32_0 = arith.constant 0 : i32
    %c0_i32_1 = arith.constant 0 : i32
    return %c0_i32, %c0_i32_0 : i32, i32
  }
  func.func @transform_2(%arg0: i32) -> (i32, i32) {
    %c0_i32 = arith.constant 0 : i32
    %c0_i32_0 = arith.constant 0 : i32
    %c0_i32_1 = arith.constant 0 : i32
    return %c0_i32, %c0_i32_0 : i32, i32
  }
  func.func @transform_3(%arg0: i32) -> (i32, i32, i32) {
    %c0_i32 = arith.constant 0 : i32
    %c0_i32_0 = arith.constant 0 : i32
    %c0_i32_1 = arith.constant 0 : i32
    return %arg0, %c0_i32, %c0_i32_0 : i32, i32, i32
  }
}

</mosaic_0001>

<bundles_post_ra>
// kernel: tpu_custom_call.1
= control target key start
LH: loop header
LB: loop body
LE: loop exit
PB: predicated region body
PF: predicated region fallthrough
CT: control target
= control target key end

     0   :  { %8 = vsyncpa [#allocation3], 0  ;;  %s2561_s0 = inlined_call_operand.hbm [shape: f32[8,1152], index: 0, kind: input, shape index: {}]   ;;  %s2562_s1 = inlined_call_operand.hbm [shape: bf16[256,512], index: 1, kind: input, shape index: {}]   ;;  %s2563_s2 = inlined_call_operand.hbm [shape: bf16[256,512], index: 2, kind: input, shape index: {}]   ;;  %s2564_s3 = inlined_call_operand.hbm [shape: f32[8,8,512], index: 3, kind: output, shape index: {}]  }
   0x1   :  { %9 = vsyncpa [#allocation6], 0 }
   0x2   :  { %10 = vsyncpa [#allocation4], 0 }
   0x3   :  { %12 = vsyncpa [#allocation4 + $0x1], 0  ;;  %s2076_s12 = smov 0   ;;  %s2078_s13 = smov 0  }
   0x4   :  { %s2080_s14 = smov 0   ;;  %s2082_s15 = smov 0  }
   0x5 LB: > { %s2097_s16 = sadd.s32 4294967295, %s2046_s15   ;;  %s1470_s17 = sadd.s32 4294967294, %s2046_s15   ;;  %s2046_s15 = sphi %s2082_s15, %s2642_s15   ;;  %s2042_s14 = sphi %s2080_s14, %s2641_s14   ;;  %s2038_s13 = sphi %s2078_s13, %s2640_s13   ;;  %s2034_s12 = sphi %s2076_s12, %s2639_s12  }
   0x6   : > { %s2101_s18 = sadd.s32 1, %s2046_s15   ;;  %s88_s19 = sadd.s32 1, %s2042_s14 }
   0x7   : > { %s85_s20 = ssub.s32 %s2046_s15, %s2101_s18  ;;  %p98_p0 = scmp.ne.s32.totalorder %s2042_s14, %s2038_s13 }
   0x8   : > { %p86_p1 = scmp.eq.s32.totalorder %s85_s20, 0  ;;  %p99_p2 = scmp.eq.s32.totalorder %s2097_s16, 1 }
   0x9   : > { %p104_p3 = scmp.ne.s32.totalorder %s2038_s13, %s2034_s12  ;;  %p105_p4 = scmp.eq.s32.totalorder %s1470_s17, 1 }
   0xa   : > { %s2112_s21 = scalar_select %p86_p1, %s2042_s14, %s88_s19  }
   0xb   : > { %p2114_p5 = por %p99_p2, %p98_p0  ;;  %p2118_p6 = por %p105_p4, %p104_p3 }
   0xc   : > { %p1471_p7 = scmp.ge.s32.totalorder %s2046_s15, 1  ;;  %p112_p8 = scmp.lt.s32.totalorder %s2046_s15, 3 }
   0xd   : > { %s2589_s22 = scalar_select %p2114_p5, 1, 0 }
   0xe   : > { %s2590_s23 = scalar_select %p2118_p6, 1, 0 }
   0xf   : > { %p2565_p9 = scmp.eq.s32.totalorder %s2097_s16, 0  ;;  %p2125_p10 = pnand %p1471_p7, %p112_p8 }
  0x10   : > { %s2048_s25 = smov [#allocation5]   ;;  %s2049_s28 = smov [#allocation2]  }
  0x11   : > { %s135_s26 = sshll.u32 %s2048_s25, 4  ;;  %p1648_p11 = pneg %p2125_p10  ;;  %s136_s26 = int_to_ptr.vmem [resolvable:$true] %s135_s26 }
  0x12   : > { %s125_s29 = sshll.u32 %s2049_s28, 4  ;;  %s2050_s30 = smov [#allocation7]   ;;  %s126_s29 = int_to_ptr.vmem [resolvable:$true] %s125_s29 }
  0x13   : > { %p2133_p12 = pnand %p2565_p9, %p1648_p11  ;;  %s148_s4 = sshll.u32 %s2050_s30, 4  ;;  %s149_s4 = int_to_ptr.vmem [resolvable:$true] %s148_s4 }
  0x14   : > { %s1911_s5 = scalar_lea.vmem %s136_s26, 8192  ;;  %p1919_p3 = scmp.lt.s32.totalorder %s136_s26, %s136_s26 }
  0x15   : > { %p1902_p13 = pneg %p2133_p12  ;;  %p1912_p0 = scmp.ne.s32.totalorder %s136_s26, %s1911_s5 }
  0x16   : > { %p1920_p4 = scmp.lt.s32.totalorder %s1911_s5, %s1911_s5 }
  0x17   : > { %p1914_p1 = pnand %p1912_p0, %p1902_p13 }
  0x18   : > { %p1921_p7 = por %p1920_p4, %p1919_p3 }
  0x19   : > { %p1915_p2 = pneg %p1914_p1 }
  0x1b   : > { %p1922_p8 = pnand %p1921_p7, %p1915_p2 }
  0x1d   : > { %1925 = shalt.err (!%p1922_p8)
}
  0x1e   : > { %s2051_s6 = smov 256   ;;  %s2052_s7 = smov 16  }
  0x1f   : > { %1654 = dma.hbm_to_vmem [thread:$0]  (!%p2133_p12), %s2562_s1, 8192, %s136_s26, [#allocation6], %s2051_s6, %s2051_s6, %s2052_s7  }
  0x20   : > { %s1937_s10 = scalar_lea.vmem %s126_s29, 1152  ;;  %p1945_p9 = scmp.lt.s32.totalorder %s126_s29, %s126_s29 }
  0x21   : > { %p1938_p11 = scmp.ne.s32.totalorder %s126_s29, %s1937_s10  ;;  %p1946_p6 = scmp.lt.s32.totalorder %s1937_s10, %s1937_s10 }
  0x23   : > { %p1940_p0 = pnand %p1938_p11, %p1902_p13  ;;  %p1947_p3 = por %p1946_p6, %p1945_p9 }
  0x25   : > { %p1941_p1 = pneg %p1940_p0 }
  0x27   : > { %p1948_p2 = pnand %p1947_p3, %p1941_p1 }
  0x29   : > { %1951 = shalt.err (!%p1948_p2)
}
  0x2a   : > { %1651 = dma.hbm_to_vmem [thread:$0]  (!%p2133_p12), %s2561_s0, 1152, %s126_s29, [#allocation3]  }
  0x2b   : > { %s1963_s19 = scalar_lea.vmem %s149_s4, 8192  ;;  %p1971_p11 = scmp.lt.s32.totalorder %s149_s4, %s149_s4 }
  0x2c   : > { %p1964_p4 = scmp.ne.s32.totalorder %s149_s4, %s1963_s19  ;;  %p1972_p0 = scmp.lt.s32.totalorder %s1963_s19, %s1963_s19 }
  0x2e   : > { %p1966_p7 = pnand %p1964_p4, %p1902_p13  ;;  %p1973_p5 = por %p1972_p0, %p1971_p11 }
  0x30   : > { %p1967_p8 = pneg %p1966_p7 }
  0x32   : > { %p1974_p6 = pnand %p1973_p5, %p1967_p8 }
  0x34   : > { %1977 = shalt.err (!%p1974_p6)
}
  0x35   : > { %1657 = dma.hbm_to_vmem [thread:$0]  (!%p2133_p12), %s2563_s2, 8192, %s149_s4, [#allocation6], %s2051_s6, %s2051_s6, %s2052_s7  }
  0x36   : > { %164 = sbr.rel (%p2125_p10) target bundleno = 481 (0x1e1), region = 32 }
  0x3b   : > { %p2593_p9 = scmp.eq.s32.totalorder %s2097_s16, 0 }
  0x3d   : > { %2021 = dma.done.wait (%p2593_p9), [#allocation3], 1152   ;;  %p2594_p13 = pmov %p2593_p9 }
  0x3e   : > { %p2595_p1 = pmov %p2593_p9 }
  0x3f   : > { %2023 = vsyncadd (%p2594_p13), [#allocation3], 4294966144 }
  0x40   : > { %2025 = dma.done.wait (%p2595_p1), [#allocation6], 16384   ;;  %p2596_p5 = pmov %p2595_p1 }
  0x41   : > { %v2173_v0 = vld [vmem:[#allocation5 + $0xe4] ss:$16 sps:$4 sm:$0xff]   ;;  %v2175_v1 = vld [vmem:[#allocation5 + $0xec] ss:$16 sps:$4 sm:$0xff]   ;;  %v2178_v2 = vld [vmem:[#allocation5 + $0xe0] ss:$16 sps:$4 sm:$0xff]  }
  0x42   : > { %2027 = vsyncadd (%p2596_p5), [#allocation6], 4294950912  ;;  %632 = vmatprep.subr.bf16.mxu0 %v2173_v0  ;;  %v2180_v3 = vld [vmem:[#allocation5 + $0xe8] ss:$16 sps:$4 sm:$0xff]   ;;  %685 = vmatprep.subr.bf16.mxu1 %v2175_v1  ;;  %v2183_v4 = vld [vmem:[#allocation5 + $0xc4] ss:$16 sps:$4 sm:$0xff]  }
  0x43   : > { %633 = vmatpush1.bf16.msra.mxu0 %v2178_v2  ;;  %686 = vmatpush1.bf16.msra.mxu1 %v2180_v3  ;;  %v2187_v5 = vld [vmem:[#allocation5 + $0xcc] ss:$16 sps:$4 sm:$0xff]   ;;  %v2189_v6 = vld [vmem:[#allocation5 + $0xc0] ss:$16 sps:$4 sm:$0xff]   ;;  %v2192_v7 = vld [vmem:[#allocation5 + $0xc8] ss:$16 sps:$4 sm:$0xff]  }
  0x44   : > { %634 = vmatprep.subr.bf16.mxu0 %v2183_v4  ;;  %687 = vmatprep.subr.bf16.mxu1 %v2187_v5  ;;  %v2195_v8 = vld [vmem:[#allocation5 + $0xa4] ss:$16 sps:$4 sm:$0xff]   ;;  %v2197_v9 = vld [vmem:[#allocation5 + $0xac] ss:$16 sps:$4 sm:$0xff]   ;;  %v2199_v10 = vld [vmem:[#allocation5 + $0xa0] ss:$16 sps:$4 sm:$0xff]  }
  0x45   : > { %v2201_v11 = vld [vmem:[#allocation5 + $0xa8] ss:$16 sps:$4 sm:$0xff]   ;;  %v2205_v12 = vld [vmem:[#allocation5 + $0x84] ss:$16 sps:$4 sm:$0xff]   ;;  %v2209_v13 = vld [vmem:[#allocation5 + $0x8c] ss:$16 sps:$4 sm:$0xff]  }
  0x46   : > { %v2211_v14 = vld [vmem:[#allocation5 + $0x80] ss:$16 sps:$4 sm:$0xff]   ;;  %v2215_v15 = vld [vmem:[#allocation5 + $0x88] ss:$16 sps:$4 sm:$0xff]   ;;  %v2217_v16 = vld [vmem:[#allocation5 + $0x64] ss:$16 sps:$4 sm:$0xff]  }
  0x47   : > { %635 = vmatpush1.bf16.msra.mxu0 %v2189_v6  ;;  %688 = vmatpush1.bf16.msra.mxu1 %v2192_v7  ;;  %v2221_v17 = vld [vmem:[#allocation5 + $0x6c] ss:$16 sps:$4 sm:$0xff]   ;;  %v2223_v18 = vld [vmem:[#allocation5 + $0x60] ss:$16 sps:$4 sm:$0xff]   ;;  %v2225_v19 = vld [vmem:[#allocation5 + $0x68] ss:$16 sps:$4 sm:$0xff]  }
  0x48   : > { %636 = vmatprep.subr.bf16.mxu0 %v2195_v8  ;;  %689 = vmatprep.subr.bf16.mxu1 %v2197_v9  ;;  %v2229_v20 = vld [vmem:[#allocation5 + $0x44] ss:$16 sps:$4 sm:$0xff]   ;;  %v2233_v21 = vld [vmem:[#allocation5 + $0x4c] ss:$16 sps:$4 sm:$0xff]   ;;  %v2235_v22 = vld [vmem:[#allocation5 + $0x40] ss:$16 sps:$4 sm:$0xff]  }
  0x49   : > { %v2239_v23 = vld [vmem:[#allocation5 + $0x48] ss:$16 sps:$4 sm:$0xff]   ;;  %v2241_v24 = vld [vmem:[#allocation5 + $0x24] ss:$16 sps:$4 sm:$0xff]   ;;  %v2245_v25 = vld [vmem:[#allocation5 + $0x2c] ss:$16 sps:$4 sm:$0xff]  }
  0x4a   : > { %v2247_v26 = vld [vmem:[#allocation5 + $0x20] ss:$16 sps:$4 sm:$0xff]   ;;  %v2249_v27 = vld [vmem:[#allocation5 + $0x28] ss:$16 sps:$4 sm:$0xff]   ;;  %v2253_v28 = vld [vmem:[#allocation5 + $0x4] ss:$16 sps:$4 sm:$0xff]  }
  0x4b   : > { %637 = vmatpush1.bf16.msra.mxu0 %v2199_v10  ;;  %690 = vmatpush1.bf16.msra.mxu1 %v2201_v11  ;;  %v2257_v29 = vld [vmem:[#allocation5 + $0xc] ss:$16 sps:$4 sm:$0xff]   ;;  %v2259_v30 = vld [vmem:[#allocation5] ss:$16 sps:$4 sm:$0xff]   ;;  %v2263_v31 = vld [vmem:[#allocation5 + $0x8] ss:$16 sps:$4 sm:$0xff]  }
  0x4c   : > { %638 = vmatprep.subr.bf16.mxu0 %v2205_v12  ;;  %691 = vmatprep.subr.bf16.mxu1 %v2209_v13  ;;  %v2265_v32 = vld [vmem:[#allocation5 + $0x1e4] ss:$16 sps:$4 sm:$0xff]   ;;  %s2268_s24 = sshll.u32 %s2097_s16, 9  ;;  %v2272_v33 = vld [vmem:[#allocation5 + $0x1ec] ss:$16 sps:$4 sm:$0xff]   ;;  %s188_s20 = sand.u32 1, %s2038_s13  }
  0x4d   : > { %v2274_v34 = vld [vmem:[#allocation5 + $0x1e0] ss:$16 sps:$4 sm:$0xff]   ;;  %v2276_v35 = vld [vmem:[#allocation5 + $0x1e8] ss:$16 sps:$4 sm:$0xff]   ;;  %s1624_s26 = sadd.s32 128, %s2268_s24  ;;  %s194_s27 = sshra.s32 %s2268_s24, 7 }
  0x4e   : > { %v2281_v36 = vld [vmem:[#allocation5 + $0x1c4] ss:$16 sps:$4 sm:$0xff]   ;;  %v2285_v37 = vld [vmem:[#allocation5 + $0x1cc] ss:$16 sps:$4 sm:$0xff]   ;;  %s202_s28 = sshra.s32 %s1624_s26, 7  ;;  %s2300_s29 = sshll.u32 %s194_s27, 3 }
  0x4f   : > { %639 = vmatpush1.bf16.msra.mxu0 %v2211_v14  ;;  %692 = vmatpush1.bf16.msra.mxu1 %v2215_v15  ;;  %v2288_v38 = vld [vmem:[#allocation5 + $0x1c0] ss:$16 sps:$4 sm:$0xff]   ;;  %v2292_v39 = vld [vmem:[#allocation5 + $0x1c8] ss:$16 sps:$4 sm:$0xff]   ;;  %v2294_v40 = vld [vmem:[#allocation5 + $0x1a4] ss:$16 sps:$4 sm:$0xff]  }
  0x50   : > { %640 = vmatprep.subr.bf16.mxu0 %v2217_v16  ;;  %693 = vmatprep.subr.bf16.mxu1 %v2221_v17  ;;  %2597 = vst [vmem:[#allocation12_spill] sm:$0xff] %v2294_v40  ;;  %v2298_v41 = vld [vmem:[#allocation5 + $0x1ac] ss:$16 sps:$4 sm:$0xff]   ;;  %s1484_s30 = sshll.u32 %s202_s28, 3  ;;  %v2302_v42 = vld [vmem:[#allocation5 + $0x1a0] ss:$16 sps:$4 sm:$0xff]  }
  0x51   : > { %2598 = vst [vmem:[#allocation13_spill] sm:$0xff] %v2298_v41  ;;  %2599 = vst [vmem:[#allocation14_spill] sm:$0xff] %v2302_v42  ;;  %v2304_v43 = vld [vmem:[#allocation5 + $0x1a8] ss:$16 sps:$4 sm:$0xff]   ;;  %s1626_s4 = sadd.s32 256, %s2268_s24  ;;  %s1628_s5 = sadd.s32 384, %s2268_s24 }
  0x52   : > { %2600 = vst [vmem:[#allocation15_spill] sm:$0xff] %v2304_v43  ;;  %v2310_v44 = vld [vmem:[#allocation5 + $0x184] ss:$16 sps:$4 sm:$0xff]   ;;  %v2314_v45 = vld [vmem:[#allocation5 + $0x18c] ss:$16 sps:$4 sm:$0xff]   ;;  %s2316_s6 = sshra.s32 %s1626_s4, 7 }
  0x53   : > { %641 = vmatpush1.bf16.msra.mxu0 %v2223_v18  ;;  %694 = vmatpush1.bf16.msra.mxu1 %v2225_v19  ;;  %2601 = vst [vmem:[#allocation16_spill] sm:$0xff] %v2310_v44  ;;  %2602 = vst [vmem:[#allocation17_spill] sm:$0xff] %v2314_v45  ;;  %s2318_s7 = sshra.s32 %s1628_s5, 7  ;;  %s197_s8 = scalar_lea.vmem [#allocation2], %s2300_s29  ;;  %v2323_v48 = vld [vmem:[#allocation5 + $0x180] ss:$16 sps:$4 sm:$0xff]  }
  0x54   : > { %642 = vmatprep.subr.bf16.mxu0 %v2229_v20  ;;  %695 = vmatprep.subr.bf16.mxu1 %v2233_v21  ;;  %v199_v46 = vld [vmem:[%s197_s8 + $0x8] sm:$0xff]  ;;  %s205_s9 = scalar_lea.vmem [#allocation2], %s1484_s30  ;;  %2603 = vst [vmem:[#allocation18_spill] sm:$0xff] %v2323_v48  ;;  %v2325_v49 = vld [vmem:[#allocation5 + $0x188] ss:$16 sps:$4 sm:$0xff]   ;;  %s1486_s10 = sshll.u32 %s2316_s6, 3 }
  0x55   : > { %v207_v47 = vld [vmem:[%s205_s9 + $0x8] sm:$0xff]  ;;  %2604 = vst [vmem:[#allocation19_spill] sm:$0xff] %v2325_v49  ;;  %v2333_v52 = vld [vmem:[#allocation5 + $0x16c] ss:$16 sps:$4 sm:$0xff]   ;;  %s1488_s11 = sshll.u32 %s2318_s7, 3  ;;  %s213_s17 = scalar_lea.vmem [#allocation2], %s1486_s10 }
  0x56   : > { %v2327_v50 = vld [vmem:[#allocation5 + $0x164] ss:$16 sps:$4 sm:$0xff]   ;;  %v2329_v51 = vpack.c.bf16 %v207_v47, %v199_v46  ;;  %2606 = vst [vmem:[#allocation21_spill] sm:$0xff] %v2333_v52  ;;  %v2337_v53 = vld [vmem:[#allocation5 + $0x160] ss:$16 sps:$4 sm:$0xff]   ;;  %v198_v58 = vld [vmem:[%s197_s8] sm:$0xff] }
  0x57   : > { %643 = vmatpush1.bf16.msra.mxu0 %v2235_v22  ;;  %696 = vmatpush1.bf16.msra.mxu1 %v2239_v23  ;;  %2605 = vst [vmem:[#allocation20_spill] sm:$0xff] %v2327_v50  ;;  %2607 = vst [vmem:[#allocation22_spill] sm:$0xff] %v2337_v53  ;;  %v2339_v54 = vld [vmem:[#allocation5 + $0x168] ss:$16 sps:$4 sm:$0xff]   ;;  %v2343_v57 = vld [vmem:[#allocation5 + $0x144] ss:$16 sps:$4 sm:$0xff]  }
  0x58   : > { %644 = vmatprep.subr.bf16.mxu0 %v2241_v24  ;;  %697 = vmatprep.subr.bf16.mxu1 %v2245_v25  ;;  %2608 = vst [vmem:[#allocation23_spill] sm:$0xff] %v2339_v54  ;;  %v229_v55 = vunpack.c.l.bf16 %v2329_v51  ;;  %v231_v56 = vunpack.c.h.bf16 %v2329_v51  ;;  %2609 = vst [vmem:[#allocation24_spill] sm:$0xff] %v2343_v57  ;;  %v206_v59 = vld [vmem:[%s205_s9] sm:$0xff]  ;;  %v2351_v63 = vld [vmem:[#allocation5 + $0x140] ss:$16 sps:$4 sm:$0xff]   ;;  %s221_s19 = scalar_lea.vmem [#allocation2], %s1488_s11 }
  0x59   : > { %v2349_v62 = vld [vmem:[#allocation5 + $0x14c] ss:$16 sps:$4 sm:$0xff]   ;;  %2611 = vst [vmem:[#allocation26_spill] sm:$0xff] %v2351_v63  ;;  %s1479_s25 = sshll.u32 %s188_s20, 7  ;;  %s1630_s26 = sshll.u32 %s2097_s16, 11 }
  0x5a   : > { %v237_v60 = vsub.f32 %v199_v46, %v229_v55  ;;  %v239_v61 = vsub.f32 %v207_v47, %v231_v56  ;;  %2610 = vst [vmem:[#allocation25_spill] sm:$0xff] %v2349_v62  ;;  %v2359_v46 = vld [vmem:[#allocation5 + $0x124] ss:$16 sps:$4 sm:$0xff]   ;;  %v2363_v47 = vld [vmem:[#allocation5 + $0x12c] ss:$16 sps:$4 sm:$0xff]   ;;  %s2488_s24 = scalar_lea.vmem [#allocation8], %s1479_s25  ;;  %s2511_s16 = scalar_lea.hbm %s2564_s3, %s1630_s26 }
  0x5b   : > { %645 = vmatpush1.bf16.msra.mxu0 %v2247_v26  ;;  %698 = vmatpush1.bf16.msra.mxu1 %v2249_v27  ;;  %2614 = vst [vmem:[#allocation29_spill] sm:$0xff] %v2359_v46  ;;  %2615 = vst [vmem:[#allocation30_spill] sm:$0xff] %v2363_v47  ;;  %v2365_v55 = vld [vmem:[#allocation5 + $0x120] ss:$16 sps:$4 sm:$0xff]   ;;  %v2367_v56 = vld [vmem:[#allocation5 + $0x128] ss:$16 sps:$4 sm:$0xff]  }
  0x5c   : > { %646 = vmatprep.subr.bf16.mxu0 %v2253_v28  ;;  %699 = vmatprep.subr.bf16.mxu1 %v2257_v29  ;;  %s1381_s27 = sshll.u32 %s2488_s24, 4  ;;  %s2521_s30 = scalar_lea.sflag [#allocation4], %s188_s20  ;;  %s2513_s27 = int_to_ptr.vmem [resolvable:$true] %s1381_s27 }
  0x5d   : > { %s1978_s4 = scalar_lea.vmem %s2513_s27, 2048  ;;  %p2637_p12 = scmp.ne.s32.totalorder %s2589_s22, 0 }
  0x5e   : > { %p1979_p10 = scmp.ne.s32.totalorder %s2513_s27, %s1978_s4  ;;  %s2053_s5 = smov [#allocation8]  }
  0x5f   : > { %647 = vmatpush1.bf16.msra.mxu0 %v2259_v30  ;;  %700 = vmatpush1.bf16.msra.mxu1 %v2263_v31  ;;  %s1982_s6 = sshll.u32 %s2053_s5, 4  ;;  %s1983_s6 = int_to_ptr.vmem [resolvable:$false] %s1982_s6 }
  0x60   : > { %648 = vmatprep.subr.bf16.mxu0 %v2265_v32  ;;  %701 = vmatprep.subr.bf16.mxu1 %v2272_v33  ;;  %p1980_p3 = pnand %p1979_p10, %p2637_p12  ;;  %s1984_s7 = scalar_lea.vmem %s1983_s6, 4096 }
  0x61   : > { %p1985_p4 = scmp.lt.s32.totalorder %s2513_s27, %s1983_s6  ;;  %p1986_p7 = scmp.lt.s32.totalorder %s1984_s7, %s1978_s4 }
  0x62   : > { %p1981_p2 = pneg %p1980_p3 }
  0x63   : > { %649 = vmatpush2.bf16.msra.mxu0 %v2274_v34  ;;  %702 = vmatpush2.bf16.msra.mxu1 %v2276_v35  ;;  %p1987_p8 = por %p1986_p7, %p1985_p4 }
  0x64   : > { %650 = vmatprep.subr.bf16.mxu0 %v2281_v36  ;;  %703 = vmatprep.subr.bf16.mxu1 %v2285_v37 }
  0x65   : > { %p1988_p11 = pnand %p1987_p8, %p1981_p2 }
  0x67   : > { %651 = vmatpush2.bf16.msra.mxu0 %v2288_v38  ;;  %704 = vmatpush2.bf16.msra.mxu1 %v2292_v39 }
  0x68   : > { %652 = vmatprep.subr.bf16.mxu0 %v2294_v40  ;;  %705 = vmatprep.subr.bf16.mxu1 %v2298_v41 }
  0x6b   : > { %653 = vmatpush2.bf16.msra.mxu0 %v2302_v42  ;;  %706 = vmatpush2.bf16.msra.mxu1 %v2304_v43  ;;  %v2355_v43 = vpack.c.bf16 %v206_v59, %v198_v58  ;;  %v2383_v42 = vld [vmem:[#allocation5 + $0x100] ss:$16 sps:$4 sm:$0xff]  }
  0x6c   : > { %654 = vmatprep.subr.bf16.mxu0 %v2310_v44  ;;  %707 = vmatprep.subr.bf16.mxu1 %v2314_v45  ;;  %v2353_v45 = vld [vmem:[#allocation5 + $0x148] ss:$16 sps:$4 sm:$0xff]   ;;  %v245_v44 = vpack.c.bf16 %v239_v61, %v237_v60  ;;  %v2371_v61 = vld [vmem:[#allocation5 + $0x104] ss:$16 sps:$4 sm:$0xff]  }
  0x6d   : > { %2612 = vst [vmem:[#allocation27_spill] sm:$0xff] %v2353_v45  ;;  %2613 = vst [vmem:[#allocation28_spill] sm:$0xff] %v2355_v43 }
  0x6e   : > { %664 = vmatprep.mubr.bf16.mxu0 %v245_v44  ;;  %717 = vmatprep.mubr.bf16.mxu1 %v245_v44 }
  0x6f   : > { %655 = vmatpush2.bf16.msra.mxu0 %v2323_v48  ;;  %708 = vmatpush2.bf16.msra.mxu1 %v2325_v49  ;;  %v215_v48 = vld [vmem:[%s213_s17 + $0x8] sm:$0xff] }
  0x70   : > { %656 = vmatprep.subr.bf16.mxu0 %v2327_v50  ;;  %709 = vmatprep.subr.bf16.mxu1 %v2333_v52  ;;  %v223_v49 = vld [vmem:[%s221_s19 + $0x8] sm:$0xff]  ;;  %v214_v52 = vld [vmem:[%s213_s17] sm:$0xff] }
  0x71   : > { %v2369_v60 = vpack.c.bf16 %v223_v49, %v215_v48 }
  0x73   : > { %657 = vmatpush2.bf16.msra.mxu0 %v2337_v53  ;;  %710 = vmatpush2.bf16.msra.mxu1 %v2339_v54  ;;  %2616 = vst [vmem:[#allocation31_spill] sm:$0xff] %v2369_v60  ;;  %v228_v54 = vunpack.c.l.bf16 %v2355_v43  ;;  %v230_v53 = vunpack.c.h.bf16 %v2355_v43  ;;  %v233_v44 = vunpack.c.l.bf16 %v2369_v60  ;;  %v235_v50 = vunpack.c.h.bf16 %v2369_v60 }
  0x74   : > { %658 = vmatprep.subr.bf16.mxu0 %v2343_v57  ;;  %711 = vmatprep.subr.bf16.mxu1 %v2349_v62  ;;  %v222_v62 = vld [vmem:[%s221_s19] sm:$0xff] }
  0x75   : > { %v2379_v57 = vld [vmem:[#allocation5 + $0x10c] ss:$16 sps:$4 sm:$0xff]   ;;  %v236_v41 = vsub.f32 %v198_v58, %v228_v54  ;;  %v238_v43 = vsub.f32 %v206_v59, %v230_v53  ;;  %v2385_v40 = vpack.c.bf16 %v222_v62, %v214_v52 }
  0x77   : > { %659 = vmatpush2.bf16.msra.mxu0 %v2351_v63  ;;  %712 = vmatpush2.bf16.msra.mxu1 %v2353_v45  ;;  %v2389_v45 = vld [vmem:[#allocation5 + $0x108] ss:$16 sps:$4 sm:$0xff]   ;;  %v244_v63 = vpack.c.bf16 %v238_v43, %v236_v41  ;;  %v232_v60 = vunpack.c.l.bf16 %v2385_v40  ;;  %v234_v54 = vunpack.c.h.bf16 %v2385_v40  ;;  %v1839_v43 = vld [vmem:[#allocation7 + $0x4c] ss:$16 sps:$4 sm:$0xff]  }
  0x78   : > { %660 = vmatprep.subr.bf16.mxu0 %v2359_v46  ;;  %713 = vmatprep.subr.bf16.mxu1 %v2363_v47  ;;  %v241_v47 = vsub.f32 %v215_v48, %v233_v44  ;;  %v243_v46 = vsub.f32 %v223_v49, %v235_v50  ;;  %v1837_v48 = vld [vmem:[#allocation7 + $0x48] ss:$16 sps:$4 sm:$0xff]   ;;  %v1842_v49 = vld [vmem:[#allocation7 + $0x24] ss:$16 sps:$4 sm:$0xff]   ;;  %v1845_v50 = vld [vmem:[#allocation7 + $0x2c] ss:$16 sps:$4 sm:$0xff]  }
  0x79   : > { %v240_v58 = vsub.f32 %v214_v52, %v232_v60  ;;  %v242_v59 = vsub.f32 %v222_v62, %v234_v54  ;;  %v1840_v52 = vld [vmem:[#allocation7 + $0x20] ss:$16 sps:$4 sm:$0xff]   ;;  %v1851_v62 = vld [vmem:[#allocation7 + $0xc] ss:$16 sps:$4 sm:$0xff]   ;;  %v1855_v60 = vld [vmem:[#allocation7 + $0x1e8] ss:$16 sps:$4 sm:$0xff]  }
  0x7a   : > { %v247_v53 = vpack.c.bf16 %v243_v46, %v241_v47  ;;  %v1849_v46 = vld [vmem:[#allocation7 + $0x8] ss:$16 sps:$4 sm:$0xff]   ;;  %v1854_v47 = vld [vmem:[#allocation7 + $0x1e4] ss:$16 sps:$4 sm:$0xff]   ;;  %v1863_v44 = vld [vmem:[#allocation7 + $0x1cc] ss:$16 sps:$4 sm:$0xff]  }
  0x7b   : > { %661 = vmatpush2.bf16.msra.mxu0 %v2365_v55  ;;  %714 = vmatpush2.bf16.msra.mxu1 %v2367_v56  ;;  %v246_v41 = vpack.c.bf16 %v242_v59, %v240_v58  ;;  %v1858_v54 = vld [vmem:[#allocation7 + $0x1c0] ss:$16 sps:$4 sm:$0xff]   ;;  %v1866_v58 = vld [vmem:[#allocation7 + $0x1a4] ss:$16 sps:$4 sm:$0xff]   ;;  %v1869_v59 = vld [vmem:[#allocation7 + $0x1ac] ss:$16 sps:$4 sm:$0xff]  }
  0x7c   : > { %662 = vmatprep.subr.bf16.mxu0 %v2371_v61  ;;  %715 = vmatprep.subr.bf16.mxu1 %v2379_v57 }
  0x7f   : > { %663 = vmatpush2.bf16.msra.mxu0 %v2383_v42  ;;  %716 = vmatpush2.bf16.msra.mxu1 %v2389_v45 }
  0x80   : > { %738 = vmatprep.subr.bf16.mxu0 %v2173_v0  ;;  %791 = vmatprep.subr.bf16.mxu1 %v2175_v1  ;;  %v2617_v0 = vld [vmem:[#allocation12_spill] sm:$0xff]  ;;  %v2618_v1 = vld [vmem:[#allocation13_spill] sm:$0xff] }
  0x82   : > { %665 = vmatmul.mubr.bf16.vlgmr.msra.gmra.mxu0 %v244_v63  ;;  %718 = vmatmul.mubr.bf16.vlgmr.msra.gmra.mxu1 %v244_v63  ;;  %v1846_v63 = vld [vmem:[#allocation7] ss:$16 sps:$4 sm:$0xff]  }
  0x83   : > { %739 = vmatpush1.bf16.msra.mxu0 %v2178_v2  ;;  %792 = vmatpush1.bf16.msra.mxu1 %v2180_v3  ;;  %v2619_v2 = vld [vmem:[#allocation14_spill] sm:$0xff]  ;;  %v2620_v3 = vld [vmem:[#allocation15_spill] sm:$0xff] }
  0x84   : > { %740 = vmatprep.subr.bf16.mxu0 %v2183_v4  ;;  %793 = vmatprep.subr.bf16.mxu1 %v2187_v5  ;;  %v2621_v4 = vld [vmem:[#allocation16_spill] sm:$0xff]  ;;  %v2622_v5 = vld [vmem:[#allocation17_spill] sm:$0xff] }
  0x85   : > { %674 = vmatprep.mubr.bf16.mxu0 %v247_v53  ;;  %727 = vmatprep.mubr.bf16.mxu1 %v247_v53  ;;  %v1861_v53 = vld [vmem:[#allocation7 + $0x1c8] ss:$16 sps:$4 sm:$0xff]  }
  0x87   : > { %741 = vmatpush1.bf16.msra.mxu0 %v2189_v6  ;;  %794 = vmatpush1.bf16.msra.mxu1 %v2192_v7  ;;  %v2623_v6 = vld [vmem:[#allocation18_spill] sm:$0xff]  ;;  %v2624_v7 = vld [vmem:[#allocation19_spill] sm:$0xff] }
  0x88   : > { %742 = vmatprep.subr.bf16.mxu0 %v2195_v8  ;;  %795 = vmatprep.subr.bf16.mxu1 %v2197_v9  ;;  %v2625_v8 = vld [vmem:[#allocation20_spill] sm:$0xff]  ;;  %v2626_v9 = vld [vmem:[#allocation21_spill] sm:$0xff] }
  0x8a   : > { %675 = vmatmul.mubr.bf16.gmra.mxu0 %v246_v41  ;;  %728 = vmatmul.mubr.bf16.gmra.mxu1 %v246_v41  ;;  %v1864_v41 = vld [vmem:[#allocation7 + $0x1a0] ss:$16 sps:$4 sm:$0xff]  }
  0x8b   : > { %743 = vmatpush1.bf16.msra.mxu0 %v2199_v10  ;;  %796 = vmatpush1.bf16.msra.mxu1 %v2201_v11  ;;  %v2627_v10 = vld [vmem:[#allocation22_spill] sm:$0xff]  ;;  %v2628_v11 = vld [vmem:[#allocation23_spill] sm:$0xff] }
  0x8c   : > { %744 = vmatprep.subr.bf16.mxu0 %v2205_v12  ;;  %797 = vmatprep.subr.bf16.mxu1 %v2209_v13  ;;  %v2629_v12 = vld [vmem:[#allocation24_spill] sm:$0xff]  ;;  %v2630_v13 = vld [vmem:[#allocation25_spill] sm:$0xff] }
  0x8d   : > { %770 = vmatprep.mubr.bf16.mxu0 %v2329_v51  ;;  %823 = vmatprep.mubr.bf16.mxu1 %v2329_v51 }
  0x8f   : > { %745 = vmatpush1.bf16.msra.mxu0 %v2211_v14  ;;  %798 = vmatpush1.bf16.msra.mxu1 %v2215_v15  ;;  %v2631_v14 = vld [vmem:[#allocation26_spill] sm:$0xff]  ;;  %v2632_v15 = vld [vmem:[#allocation27_spill] sm:$0xff] }
  0x90   : > { %746 = vmatprep.subr.bf16.mxu0 %v2217_v16  ;;  %799 = vmatprep.subr.bf16.mxu1 %v2221_v17  ;;  %v2633_v16 = vld [vmem:[#allocation29_spill] sm:$0xff]  ;;  %v2634_v17 = vld [vmem:[#allocation30_spill] sm:$0xff] }
  0x93   : > { %747 = vmatpush1.bf16.msra.mxu0 %v2223_v18  ;;  %800 = vmatpush1.bf16.msra.mxu1 %v2225_v19  ;;  %v1806_v18 = vld [vmem:[#allocation7 + $0xe4] ss:$16 sps:$4 sm:$0xff]   ;;  %v1809_v19 = vld [vmem:[#allocation7 + $0xec] ss:$16 sps:$4 sm:$0xff]  }
  0x94   : > { %748 = vmatprep.subr.bf16.mxu0 %v2229_v20  ;;  %801 = vmatprep.subr.bf16.mxu1 %v2233_v21  ;;  %v1804_v20 = vld [vmem:[#allocation7 + $0xe0] ss:$16 sps:$4 sm:$0xff]   ;;  %v1807_v21 = vld [vmem:[#allocation7 + $0xe8] ss:$16 sps:$4 sm:$0xff]  }
  0x97   : > { %749 = vmatpush1.bf16.msra.mxu0 %v2235_v22  ;;  %802 = vmatpush1.bf16.msra.mxu1 %v2239_v23  ;;  %v1812_v22 = vld [vmem:[#allocation7 + $0xc4] ss:$16 sps:$4 sm:$0xff]   ;;  %v1815_v23 = vld [vmem:[#allocation7 + $0xcc] ss:$16 sps:$4 sm:$0xff]  }
  0x98   : > { %750 = vmatprep.subr.bf16.mxu0 %v2241_v24  ;;  %803 = vmatprep.subr.bf16.mxu1 %v2245_v25  ;;  %v2635_v24 = vld [vmem:[#allocation28_spill] sm:$0xff] }
  0x99   : > { %v1810_v25 = vld [vmem:[#allocation7 + $0xc0] ss:$16 sps:$4 sm:$0xff]  }
  0x9b   : > { %751 = vmatpush1.bf16.msra.mxu0 %v2247_v26  ;;  %804 = vmatpush1.bf16.msra.mxu1 %v2249_v27  ;;  %v1813_v26 = vld [vmem:[#allocation7 + $0xc8] ss:$16 sps:$4 sm:$0xff]   ;;  %v1818_v27 = vld [vmem:[#allocation7 + $0xa4] ss:$16 sps:$4 sm:$0xff]  }
  0x9c   : > { %752 = vmatprep.subr.bf16.mxu0 %v2253_v28  ;;  %805 = vmatprep.subr.bf16.mxu1 %v2257_v29  ;;  %v1821_v28 = vld [vmem:[#allocation7 + $0xac] ss:$16 sps:$4 sm:$0xff]  }
  0x9d   : > { %v2636_v29 = vld [vmem:[#allocation31_spill] sm:$0xff] }
  0x9f   : > { %753 = vmatpush1.bf16.msra.mxu0 %v2259_v30  ;;  %806 = vmatpush1.bf16.msra.mxu1 %v2263_v31  ;;  %v1816_v30 = vld [vmem:[#allocation7 + $0xa0] ss:$16 sps:$4 sm:$0xff]   ;;  %v1819_v31 = vld [vmem:[#allocation7 + $0xa8] ss:$16 sps:$4 sm:$0xff]  }
  0xa0   : > { %754 = vmatprep.subr.bf16.mxu0 %v2265_v32  ;;  %807 = vmatprep.subr.bf16.mxu1 %v2272_v33  ;;  %v1824_v32 = vld [vmem:[#allocation7 + $0x84] ss:$16 sps:$4 sm:$0xff]   ;;  %v1827_v33 = vld [vmem:[#allocation7 + $0x8c] ss:$16 sps:$4 sm:$0xff]  }
  0xa3   : > { %755 = vmatpush2.bf16.msra.mxu0 %v2274_v34  ;;  %808 = vmatpush2.bf16.msra.mxu1 %v2276_v35  ;;  %v1822_v34 = vld [vmem:[#allocation7 + $0x80] ss:$16 sps:$4 sm:$0xff]   ;;  %v1825_v35 = vld [vmem:[#allocation7 + $0x88] ss:$16 sps:$4 sm:$0xff]  }
  0xa4   : > { %756 = vmatprep.subr.bf16.mxu0 %v2281_v36  ;;  %809 = vmatprep.subr.bf16.mxu1 %v2285_v37  ;;  %v1830_v36 = vld [vmem:[#allocation7 + $0x64] ss:$16 sps:$4 sm:$0xff]   ;;  %v1833_v37 = vld [vmem:[#allocation7 + $0x6c] ss:$16 sps:$4 sm:$0xff]  }
  0xa7   : > { %757 = vmatpush2.bf16.msra.mxu0 %v2288_v38  ;;  %810 = vmatpush2.bf16.msra.mxu1 %v2292_v39  ;;  %v1828_v38 = vld [vmem:[#allocation7 + $0x60] ss:$16 sps:$4 sm:$0xff]   ;;  %v1831_v39 = vld [vmem:[#allocation7 + $0x68] ss:$16 sps:$4 sm:$0xff]  }
  0xa8   : > { %758 = vmatprep.subr.bf16.mxu0 %v2617_v0  ;;  %811 = vmatprep.subr.bf16.mxu1 %v2618_v1  ;;  %v1867_v0 = vld [vmem:[#allocation7 + $0x1a8] ss:$16 sps:$4 sm:$0xff]   ;;  %v1872_v1 = vld [vmem:[#allocation7 + $0x184] ss:$16 sps:$4 sm:$0xff]  }
  0xab   : > { %759 = vmatpush2.bf16.msra.mxu0 %v2619_v2  ;;  %812 = vmatpush2.bf16.msra.mxu1 %v2620_v3  ;;  %v1875_v2 = vld [vmem:[#allocation7 + $0x18c] ss:$16 sps:$4 sm:$0xff]   ;;  %v1870_v3 = vld [vmem:[#allocation7 + $0x180] ss:$16 sps:$4 sm:$0xff]  }
  0xac   : > { %760 = vmatprep.subr.bf16.mxu0 %v2621_v4  ;;  %813 = vmatprep.subr.bf16.mxu1 %v2622_v5  ;;  %v1873_v4 = vld [vmem:[#allocation7 + $0x188] ss:$16 sps:$4 sm:$0xff]   ;;  %v1878_v5 = vld [vmem:[#allocation7 + $0x164] ss:$16 sps:$4 sm:$0xff]  }
  0xaf   : > { %761 = vmatpush2.bf16.msra.mxu0 %v2623_v6  ;;  %814 = vmatpush2.bf16.msra.mxu1 %v2624_v7  ;;  %v1881_v6 = vld [vmem:[#allocation7 + $0x16c] ss:$16 sps:$4 sm:$0xff]   ;;  %v1876_v7 = vld [vmem:[#allocation7 + $0x160] ss:$16 sps:$4 sm:$0xff]  }
  0xb0   : > { %762 = vmatprep.subr.bf16.mxu0 %v2625_v8  ;;  %815 = vmatprep.subr.bf16.mxu1 %v2626_v9  ;;  %v1879_v8 = vld [vmem:[#allocation7 + $0x168] ss:$16 sps:$4 sm:$0xff]   ;;  %v1884_v9 = vld [vmem:[#allocation7 + $0x144] ss:$16 sps:$4 sm:$0xff]  }
  0xb3   : > { %763 = vmatpush2.bf16.msra.mxu0 %v2627_v10  ;;  %816 = vmatpush2.bf16.msra.mxu1 %v2628_v11  ;;  %v1887_v10 = vld [vmem:[#allocation7 + $0x14c] ss:$16 sps:$4 sm:$0xff]   ;;  %v1882_v11 = vld [vmem:[#allocation7 + $0x140] ss:$16 sps:$4 sm:$0xff]  }
  0xb4   : > { %764 = vmatprep.subr.bf16.mxu0 %v2629_v12  ;;  %817 = vmatprep.subr.bf16.mxu1 %v2630_v13  ;;  %v1885_v12 = vld [vmem:[#allocation7 + $0x148] ss:$16 sps:$4 sm:$0xff]   ;;  %v1890_v13 = vld [vmem:[#allocation7 + $0x124] ss:$16 sps:$4 sm:$0xff]  }
  0xb7   : > { %765 = vmatpush2.bf16.msra.mxu0 %v2631_v14  ;;  %818 = vmatpush2.bf16.msra.mxu1 %v2632_v15  ;;  %v1893_v14 = vld [vmem:[#allocation7 + $0x12c] ss:$16 sps:$4 sm:$0xff]   ;;  %v1888_v15 = vld [vmem:[#allocation7 + $0x120] ss:$16 sps:$4 sm:$0xff]  }
  0xb8   : > { %766 = vmatprep.subr.bf16.mxu0 %v2633_v16  ;;  %819 = vmatprep.subr.bf16.mxu1 %v2634_v17  ;;  %v1891_v16 = vld [vmem:[#allocation7 + $0x128] ss:$16 sps:$4 sm:$0xff]   ;;  %v1896_v17 = vld [vmem:[#allocation7 + $0x104] ss:$16 sps:$4 sm:$0xff]  }
  0xbb   : > { %767 = vmatpush2.bf16.msra.mxu0 %v2365_v55  ;;  %820 = vmatpush2.bf16.msra.mxu1 %v2367_v56  ;;  %v1857_v55 = vld [vmem:[#allocation7 + $0x1ec] ss:$16 sps:$4 sm:$0xff]   ;;  %v1852_v56 = vld [vmem:[#allocation7 + $0x1e0] ss:$16 sps:$4 sm:$0xff]  }
  0xbc   : > { %768 = vmatprep.subr.bf16.mxu0 %v2371_v61  ;;  %821 = vmatprep.subr.bf16.mxu1 %v2379_v57  ;;  %v1848_v57 = vld [vmem:[#allocation7 + $0x4] ss:$16 sps:$4 sm:$0xff]  }
  0xbd   : > { %v1860_v61 = vld [vmem:[#allocation7 + $0x1c4] ss:$16 sps:$4 sm:$0xff]  }
  0xbf   : > { %769 = vmatpush2.bf16.msra.mxu0 %v2383_v42  ;;  %822 = vmatpush2.bf16.msra.mxu1 %v2389_v45  ;;  %v1836_v42 = vld [vmem:[#allocation7 + $0x44] ss:$16 sps:$4 sm:$0xff]   ;;  %v1834_v45 = vld [vmem:[#allocation7 + $0x40] ss:$16 sps:$4 sm:$0xff]  }
  0xc0   : > { %1228 = vmatprep.subr.bf16.mxu0 %v1806_v18  ;;  %1281 = vmatprep.subr.bf16.mxu1 %v1809_v19  ;;  %v1899_v18 = vld [vmem:[#allocation7 + $0x10c] ss:$16 sps:$4 sm:$0xff]   ;;  %v1894_v19 = vld [vmem:[#allocation7 + $0x100] ss:$16 sps:$4 sm:$0xff]  }
  0xc2   : > { %771 = vmatmul.mubr.bf16.vlgmr.msra.gmra.mxu0 %v2635_v24  ;;  %824 = vmatmul.mubr.bf16.vlgmr.msra.gmra.mxu1 %v2635_v24 }
  0xc3   : > { %1229 = vmatpush1.bf16.msra.mxu0 %v1804_v20  ;;  %1282 = vmatpush1.bf16.msra.mxu1 %v1807_v21  ;;  %v1897_v20 = vld [vmem:[#allocation7 + $0x108] ss:$16 sps:$4 sm:$0xff]  }
  0xc4   : > { %1230 = vmatprep.subr.bf16.mxu0 %v1812_v22  ;;  %1283 = vmatprep.subr.bf16.mxu1 %v1815_v23 }
  0xc5   : > { %780 = vmatprep.mubr.bf16.mxu0 %v2636_v29  ;;  %833 = vmatprep.mubr.bf16.mxu1 %v2636_v29 }
  0xc7   : > { %1231 = vmatpush1.bf16.msra.mxu0 %v1810_v25  ;;  %1284 = vmatpush1.bf16.msra.mxu1 %v1813_v26 }
  0xc8   : > { %1232 = vmatprep.subr.bf16.mxu0 %v1818_v27  ;;  %1285 = vmatprep.subr.bf16.mxu1 %v1821_v28 }
  0xca   : > { %781 = vmatmul.mubr.bf16.gmra.mxu0 %v2385_v40  ;;  %834 = vmatmul.mubr.bf16.gmra.mxu1 %v2385_v40 }
  0xcb   : > { %1233 = vmatpush1.bf16.msra.mxu0 %v1816_v30  ;;  %1286 = vmatpush1.bf16.msra.mxu1 %v1819_v31 }
  0xcc   : > { %1234 = vmatprep.subr.bf16.mxu0 %v1824_v32  ;;  %1287 = vmatprep.subr.bf16.mxu1 %v1827_v33 }
  0xcd   : > { %1260 = vmatprep.mubr.bf16.mxu0 %v2329_v51  ;;  %1313 = vmatprep.mubr.bf16.mxu1 %v2329_v51  ;;  %v1843_v51 = vld [vmem:[#allocation7 + $0x28] ss:$16 sps:$4 sm:$0xff]  }
  0xcf   : > { %1235 = vmatpush1.bf16.msra.mxu0 %v1822_v34  ;;  %1288 = vmatpush1.bf16.msra.mxu1 %v1825_v35 }
  0xd0   : > { %1236 = vmatprep.subr.bf16.mxu0 %v1830_v36  ;;  %1289 = vmatprep.subr.bf16.mxu1 %v1833_v37 }
  0xd3   : > { %1237 = vmatpush1.bf16.msra.mxu0 %v1828_v38  ;;  %1290 = vmatpush1.bf16.msra.mxu1 %v1831_v39 }
  0xd4   : > { %1238 = vmatprep.subr.bf16.mxu0 %v1836_v42  ;;  %1291 = vmatprep.subr.bf16.mxu1 %v1839_v43 }
  0xd7   : > { %1239 = vmatpush1.bf16.msra.mxu0 %v1834_v45  ;;  %1292 = vmatpush1.bf16.msra.mxu1 %v1837_v48 }
  0xd8   : > { %1240 = vmatprep.subr.bf16.mxu0 %v1842_v49  ;;  %1293 = vmatprep.subr.bf16.mxu1 %v1845_v50 }
  0xdb   : > { %1241 = vmatpush1.bf16.msra.mxu0 %v1840_v52  ;;  %1294 = vmatpush1.bf16.msra.mxu1 %v1843_v51 }
  0xdc   : > { %1242 = vmatprep.subr.bf16.mxu0 %v1848_v57  ;;  %1295 = vmatprep.subr.bf16.mxu1 %v1851_v62 }
  0xdf   : > { %1243 = vmatpush1.bf16.msra.mxu0 %v1846_v63  ;;  %1296 = vmatpush1.bf16.msra.mxu1 %v1849_v46 }
  0xe0   : > { %1244 = vmatprep.subr.bf16.mxu0 %v1854_v47  ;;  %1297 = vmatprep.subr.bf16.mxu1 %v1857_v55 }
  0xe3   : > { %1245 = vmatpush2.bf16.msra.mxu0 %v1852_v56  ;;  %1298 = vmatpush2.bf16.msra.mxu1 %v1855_v60 }
  0xe4   : > { %1246 = vmatprep.subr.bf16.mxu0 %v1860_v61  ;;  %1299 = vmatprep.subr.bf16.mxu1 %v1863_v44 }
  0xe7   : > { %1247 = vmatpush2.bf16.msra.mxu0 %v1858_v54  ;;  %1300 = vmatpush2.bf16.msra.mxu1 %v1861_v53 }
  0xe8   : > { %1248 = vmatprep.subr.bf16.mxu0 %v1866_v58  ;;  %1301 = vmatprep.subr.bf16.mxu1 %v1869_v59 }
  0xeb   : > { %1249 = vmatpush2.bf16.msra.mxu0 %v1864_v41  ;;  %1302 = vmatpush2.bf16.msra.mxu1 %v1867_v0 }
  0xec   : > { %1250 = vmatprep.subr.bf16.mxu0 %v1872_v1  ;;  %1303 = vmatprep.subr.bf16.mxu1 %v1875_v2 }
  0xef   : > { %1251 = vmatpush2.bf16.msra.mxu0 %v1870_v3  ;;  %1304 = vmatpush2.bf16.msra.mxu1 %v1873_v4 }
  0xf0   : > { %1252 = vmatprep.subr.bf16.mxu0 %v1878_v5  ;;  %1305 = vmatprep.subr.bf16.mxu1 %v1881_v6 }
  0xf3   : > { %1253 = vmatpush2.bf16.msra.mxu0 %v1876_v7  ;;  %1306 = vmatpush2.bf16.msra.mxu1 %v1879_v8 }
  0xf4   : > { %1254 = vmatprep.subr.bf16.mxu0 %v1884_v9  ;;  %1307 = vmatprep.subr.bf16.mxu1 %v1887_v10 }
  0xf7   : > { %1255 = vmatpush2.bf16.msra.mxu0 %v1882_v11  ;;  %1308 = vmatpush2.bf16.msra.mxu1 %v1885_v12 }
  0xf8   : > { %1256 = vmatprep.subr.bf16.mxu0 %v1890_v13  ;;  %1309 = vmatprep.subr.bf16.mxu1 %v1893_v14 }
  0xfb   : > { %1257 = vmatpush2.bf16.msra.mxu0 %v1888_v15  ;;  %1310 = vmatpush2.bf16.msra.mxu1 %v1891_v16 }
  0xfc   : > { %1258 = vmatprep.subr.bf16.mxu0 %v1896_v17  ;;  %1311 = vmatprep.subr.bf16.mxu1 %v1899_v18 }
  0xff   : > { %1259 = vmatpush2.bf16.msra.mxu0 %v1894_v19  ;;  %1312 = vmatpush2.bf16.msra.mxu1 %v1897_v20 }
 0x102   : > { %1261 = vmatmul.mubr.bf16.vlgmr.msra.gmra.mxu0 %v2635_v24  ;;  %1314 = vmatmul.mubr.bf16.vlgmr.msra.gmra.mxu1 %v2635_v24 }
 0x103   : > { %1270 = vmatprep.mubr.bf16.mxu0 %v2636_v29  ;;  %1323 = vmatprep.mubr.bf16.mxu1 %v2636_v29 }
 0x10a   : > { %1271 = vmatmul.mubr.bf16.gmra.mxu0 %v2385_v40  ;;  %1324 = vmatmul.mubr.bf16.gmra.mxu1 %v2385_v40 }
 0x142   : > { %v666_v21 = vpop.f32.mrf.mxu0  ;;  %v719_v22 = vpop.f32.mrf.mxu1 }
 0x144   : > { %v668_v23 = vpop.f32.mrf.mxu0  ;;  %v721_v25 = vpop.f32.mrf.mxu1 }
 0x146   : > { %v670_v26 = vpop.f32.mrf.mxu0  ;;  %v723_v27 = vpop.f32.mrf.mxu1 }
 0x148   : > { %v672_v28 = vpop.f32.mrf.mxu0  ;;  %v725_v30 = vpop.f32.mrf.mxu1 }
 0x14a   : > { %v676_v31 = vpop.f32.mrf.mxu0  ;;  %v729_v32 = vpop.f32.mrf.mxu1 }
 0x14c   : > { %v678_v33 = vpop.f32.mrf.mxu0  ;;  %v731_v24 = vpop.f32.mrf.mxu1 }
 0x14e   : > { %v2477_v34 = vpop.f32.mrf.mxu0  ;;  %v2479_v35 = vpop.f32.mrf.mxu1 }
 0x150   : > { %v2481_v29 = vpop.f32.mrf.mxu0  ;;  %v2483_v40 = vpop.f32.mrf.mxu1 }
 0x182   : > { %v772_v36 = vpop.f32.mrf.mxu0  ;;  %v825_v37 = vpop.f32.mrf.mxu1 }
 0x183   : > { %v773_v47 = vadd.f32 %v772_v36, %v666_v21  ;;  %v826_v55 = vadd.f32 %v825_v37, %v719_v22 }
 0x184   : > { %v774_v38 = vpop.f32.mrf.mxu0  ;;  %v827_v39 = vpop.f32.mrf.mxu1 }
 0x185   : > { %v775_v61 = vadd.f32 %v774_v38, %v668_v23  ;;  %v828_v44 = vadd.f32 %v827_v39, %v721_v25 }
 0x186   : > { %v776_v42 = vpop.f32.mrf.mxu0  ;;  %v829_v43 = vpop.f32.mrf.mxu1 }
 0x187   : > { %v777_v41 = vadd.f32 %v776_v42, %v670_v26  ;;  %v830_v0 = vadd.f32 %v829_v43, %v723_v27 }
 0x188   : > { %v778_v45 = vpop.f32.mrf.mxu0  ;;  %v831_v48 = vpop.f32.mrf.mxu1 }
 0x189   : > { %v779_v5 = vadd.f32 %v778_v45, %v672_v28  ;;  %v832_v6 = vadd.f32 %v831_v48, %v725_v30 }
 0x18a   : > { %v782_v49 = vpop.f32.mrf.mxu0  ;;  %v835_v50 = vpop.f32.mrf.mxu1 }
 0x18b   : > { %v783_v11 = vadd.f32 %v782_v49, %v676_v31  ;;  %v836_v12 = vadd.f32 %v835_v50, %v729_v32 }
 0x18c   : > { %v784_v52 = vpop.f32.mrf.mxu0  ;;  %v837_v51 = vpop.f32.mrf.mxu1 }
 0x18d   : > { %v785_v17 = vadd.f32 %v784_v52, %v678_v33  ;;  %v838_v18 = vadd.f32 %v837_v51, %v731_v24 }
 0x18e   : > { %v786_v57 = vpop.f32.mrf.mxu0  ;;  %v839_v62 = vpop.f32.mrf.mxu1 }
 0x18f   : > { %v787_v23 = vadd.f32 %v786_v57, %v2477_v34  ;;  %v840_v25 = vadd.f32 %v839_v62, %v2479_v35 }
 0x190   : > { %v788_v63 = vpop.f32.mrf.mxu0  ;;  %v841_v46 = vpop.f32.mrf.mxu1 }
 0x191   : > { %v789_v31 = vadd.f32 %v788_v63, %v2481_v29  ;;  %v842_v32 = vadd.f32 %v841_v46, %v2483_v40 }
 0x1c2   : > { %v1262_v56 = vpop.f32.mrf.mxu0  ;;  %v1315_v60 = vpop.f32.mrf.mxu1 }
 0x1c3   : > { %v1334_v54 = vadd.f32 %v1262_v56, %v773_v47  ;;  %v1336_v53 = vadd.f32 %v1315_v60, %v826_v55 }
 0x1c4   : > { %v1264_v58 = vpop.f32.mrf.mxu0  ;;  %v1317_v59 = vpop.f32.mrf.mxu1 }
 0x1c5   : > { %1350 = vst [vmem:[%s2488_s24] sm:$0xff] %v1334_v54  ;;  %1352 = vst [vmem:[%s2488_s24 + $0x10] sm:$0xff] %v1336_v53  ;;  %v1335_v1 = vadd.f32 %v1264_v58, %v775_v61  ;;  %v1337_v2 = vadd.f32 %v1317_v59, %v828_v44 }
 0x1c6   : > { %v1266_v3 = vpop.f32.mrf.mxu0  ;;  %v1319_v4 = vpop.f32.mrf.mxu1 }
 0x1c7   : > { %1351 = vst [vmem:[%s2488_s24 + $0x8] sm:$0xff] %v1335_v1  ;;  %1353 = vst [vmem:[%s2488_s24 + $0x18] sm:$0xff] %v1337_v2  ;;  %v1338_v7 = vadd.f32 %v1266_v3, %v777_v41  ;;  %v1340_v8 = vadd.f32 %v1319_v4, %v830_v0 }
 0x1c8   : > { %v1268_v9 = vpop.f32.mrf.mxu0  ;;  %v1321_v10 = vpop.f32.mrf.mxu1 }
 0x1c9   : > { %1354 = vst [vmem:[%s2488_s24 + $0x20] sm:$0xff] %v1338_v7  ;;  %1356 = vst [vmem:[%s2488_s24 + $0x30] sm:$0xff] %v1340_v8  ;;  %v1339_v13 = vadd.f32 %v1268_v9, %v779_v5  ;;  %v1341_v14 = vadd.f32 %v1321_v10, %v832_v6 }
 0x1ca   : > { %v1272_v15 = vpop.f32.mrf.mxu0  ;;  %v1325_v16 = vpop.f32.mrf.mxu1 }
 0x1cb   : > { %1355 = vst [vmem:[%s2488_s24 + $0x28] sm:$0xff] %v1339_v13  ;;  %1357 = vst [vmem:[%s2488_s24 + $0x38] sm:$0xff] %v1341_v14  ;;  %v1342_v19 = vadd.f32 %v1272_v15, %v783_v11  ;;  %v1344_v20 = vadd.f32 %v1325_v16, %v836_v12 }
 0x1cc   : > { %v1274_v21 = vpop.f32.mrf.mxu0  ;;  %v1327_v22 = vpop.f32.mrf.mxu1 }
 0x1cd   : > { %1358 = vst [vmem:[%s2488_s24 + $0x40] sm:$0xff] %v1342_v19  ;;  %1360 = vst [vmem:[%s2488_s24 + $0x50] sm:$0xff] %v1344_v20  ;;  %v1343_v26 = vadd.f32 %v1274_v21, %v785_v17  ;;  %v1345_v27 = vadd.f32 %v1327_v22, %v838_v18 }
 0x1ce   : > { %v1276_v28 = vpop.f32.mrf.mxu0  ;;  %v1329_v30 = vpop.f32.mrf.mxu1 }
 0x1cf   : > { %1359 = vst [vmem:[%s2488_s24 + $0x48] sm:$0xff] %v1343_v26  ;;  %1361 = vst [vmem:[%s2488_s24 + $0x58] sm:$0xff] %v1345_v27  ;;  %v1346_v33 = vadd.f32 %v1276_v28, %v787_v23  ;;  %v1348_v24 = vadd.f32 %v1329_v30, %v840_v25 }
 0x1d0   : > { %v1278_v34 = vpop.f32.mrf.mxu0  ;;  %v1331_v35 = vpop.f32.mrf.mxu1 }
 0x1d1   : > { %1362 = vst [vmem:[%s2488_s24 + $0x60] sm:$0xff] %v1346_v33  ;;  %1364 = vst [vmem:[%s2488_s24 + $0x70] sm:$0xff] %v1348_v24  ;;  %v1347_v29 = vadd.f32 %v1278_v34, %v789_v31  ;;  %v1349_v40 = vadd.f32 %v1331_v35, %v842_v32 }
 0x1d3   : > { %1363 = vst [vmem:[%s2488_s24 + $0x68] sm:$0xff] %v1347_v29  ;;  %1365 = vst [vmem:[%s2488_s24 + $0x78] sm:$0xff] %v1349_v40 }
 0x1d4   : > { %1991 = shalt.err (!%p1988_p11)
}
 0x1d5   : > { %s1992_s8 = scalar_lea.hbm %s2511_s16, 2048  ;;  %s1996_s11 = scalar_lea.hbm %s2564_s3, 4096 }
 0x1d6   : > { %p1993_p0 = scmp.ne.s32.totalorder %s2511_s16, %s1992_s8  ;;  %p1997_p13 = scmp.lt.s32.totalorder %s2511_s16, %s2564_s3 }
 0x1d7   : > { %p1998_p1 = scmp.lt.s32.totalorder %s1996_s11, %s1992_s8 }
 0x1d8   : > { %p1994_p6 = pnand %p1993_p0, %p2637_p12 }
 0x1d9   : > { %p1999_p5 = por %p1998_p1, %p1997_p13 }
 0x1da   : > { %p1995_p9 = pneg %p1994_p6 }
 0x1dc   : > { %p2000_p10 = pnand %p1999_p5, %p1995_p9 }
 0x1de   : > { %2003 = shalt.err (!%p2000_p10)
}
 0x1df   : > { %s2054_s20 = smov 512   ;;  %s2055_s25 = smov 32  }
 0x1e0   : > { %1646 = dma.vmem_to_hbm [thread:$0]  (%p2637_p12), %s2513_s27, 2048, %s2511_s16, %s2521_s30, %s2054_s20, %s2054_s20, %s2055_s25  }
 0x1e1 PF: > { %p1668_p3 = scmp.ge.s32.totalorder %s2046_s15, 2  ;;  %s1396_s24 = sand.u32 1, %s2034_s12  }
 0x1e2   : > { %p2638_p2 = scmp.ne.s32.totalorder %s2590_s23, 0  ;;  %s1397_s26 = scalar_lea.sflag [#allocation4], %s1396_s24 }
 0x1e4   : > { %p1659_p4 = pnand %p1668_p3, %p2638_p2 }
 0x1e6   : > { %p1660_p7 = pneg %p1659_p4 }
 0x1e8   : > { %2029 = dma.done.wait (%p1660_p7), %s1397_s26, 2048  }
 0x1e9   : > { %2031 = vsyncadd (%p1660_p7), %s1397_s26, 4294965248  ;;  %p15_p8 = scmp.ge.s32.totalorder %s2101_s18, 4   ;;  %s2639_s12 = smov %s2038_s13 }
 0x1ea   : > { %s2640_s13 = smov %s2042_s14  ;;  %s2641_s14 = smov %s2112_s21 }
 0x1eb   : > { %s2642_s15 = smov %s2101_s18  ;;  %17 = sbr.rel (!%p15_p8) target bundleno = 5 (0x5), region = 81 }
 0x1f0   :  { %1402 = vsyncpa [#allocation3], 1 }
 0x1f1   :  { %1404 = vsyncpa [#allocation3 + $0x1], 1 }
 0x1f2   :  { %1405 = vsyncpa [#allocation6], 1 }
 0x1f3   :  { %1406 = vsyncpa [#allocation4], 1 }
 0x1f4   :  { %1408 = vsyncpa [#allocation4 + $0x1], 1 }

</bundles_post_ra>
